<compile_context>
chip_gen: v7x
topology: tpu7x:2x2x1
jax: 0.10.0
libtpu: 0.0.40
codegen_flags: <defaults>
</compile_context>

<pallas_src>
import math
from typing import NamedTuple, Tuple

import jax
import jax.numpy as jnp
import numpy as np
from jax.experimental import pallas as pl
from jax.experimental.pallas import tpu as pltpu

LANE = 128
SUBLANE = 8


def _round_up(x, m):
    return (x + m - 1) // m * m


def _ceil_div(a, b):
    return -(-a // b)


class PackedParams(NamedTuple):
    layers: Tuple            # ((wx_padded, aux), ...) per layer
    d_in: int                # true (unpadded) input feature dim
    d_out: int               # true (unpadded) output feature dim
    d_in_pad: int            # lane-padded input feature dim
    d_out_pad: int           # lane-padded output feature dim


# ---------------------------------------------------------------------------
# Kernel
# ---------------------------------------------------------------------------
def _make_kernel(n_layers):
    """Fused forward pass of the n-layer time-derivative MLP on one (stage, batch) tile.

    Args (in order): t_ref (SMEM (S,)), x_ref (VMEM (1, TB, D_pad)),
                     [w_i (VMEM (in_pad, out_pad)), a_i (VMEM (2, out_pad) f32)] * n,
                     o_ref (VMEM (1, TB, D_out_pad)).
    a_i row 0 = t-column of the concat weight, row 1 = bias.
    """

    def kernel(t_ref, x_ref, *refs):
        o_ref = refs[-1]
        w_refs = refs[:-1]
        s = pl.program_id(0)
        t = t_ref[s].astype(jnp.float32)

        # Feed the MXU in the weights' native dtype (bf16 -> native throughput);
        # accumulate in f32 via preferred_element_type.
        h = x_ref[0].astype(w_refs[0].dtype)
        for i in range(n_layers):
            w = w_refs[2 * i]
            a = w_refs[2 * i + 1]
            acc = jnp.dot(h, w[...], preferred_element_type=jnp.float32)
            acc = acc + (t * a[0:1, :] + a[1:2, :])      # one (1, N) broadcast add
            if i < n_layers - 1:
                h = jnp.tanh(acc).astype(w_refs[2 * (i + 1)].dtype)
            else:
                h = acc
        o_ref[0] = h.astype(o_ref.dtype)

    return kernel


# ---------------------------------------------------------------------------
# Parameter packing (done ONCE, outside the per-ODE-step call path)
# ---------------------------------------------------------------------------
def pack_params(params, weight_dtype=jnp.bfloat16, lane_multiple=LANE):
    """params: list of (Wx:(in, out), wt:(out,), b:(out,)) per layer.

    Returns PackedParams with Wx zero-padded to (in_pad, out_pad) in weight_dtype
    (bf16 default = native MXU dtype) and aux:(2, out_pad) f32 holding (wt, b).
    Zero padding is exact: padded input columns are 0, padded output columns get
    zero weight/bias, and tanh(0)=0 keeps padded lanes zero across layers.
    """
    layers = []
    dims = []
    for wx, wt, b in params:
        fi, fo = wx.shape
        fi_p, fo_p = _round_up(fi, lane_multiple), _round_up(fo, lane_multiple)
        wx_p = jnp.zeros((fi_p, fo_p), weight_dtype).at[:fi, :fo].set(
            jnp.asarray(wx, weight_dtype))
        aux = jnp.zeros((2, fo_p), jnp.float32)
        aux = aux.at[0, :fo].set(jnp.asarray(wt, jnp.float32))
        aux = aux.at[1, :fo].set(jnp.asarray(b, jnp.float32))
        layers.append((wx_p, aux))
        dims.append((fi, fo))

    for i in range(1, len(dims)):
        assert dims[i][0] == dims[i - 1][1], "layer dims must chain"
    # Module contract: output shape == input shape (checked on TRUE dims, not padded).
    assert dims[-1][1] == dims[0][0], "last layer output width must equal input width"

    return PackedParams(tuple(layers), dims[0][0], dims[-1][1],
                        layers[0][0].shape[0], layers[-1][0].shape[1])


def pad_state(x, packed: PackedParams, dtype=jnp.bfloat16):
    """Pad the state's feature dim to the lane-dense width (call ONCE per solve)."""
    assert x.shape[-1] == packed.d_in, "state feature dim mismatch"
    x = jnp.asarray(x, dtype)
    pad = packed.d_in_pad - packed.d_in
    if pad:
        x = jnp.pad(x, [(0, 0)] * (x.ndim - 1) + [(0, pad)])
    return x


def unpad_state(x_padded, packed: PackedParams):
    """Slice the padded state back to the true feature dim (call ONCE per solve)."""
    return x_padded[..., :packed.d_out]


# ---------------------------------------------------------------------------
# Hot path: lane-padded state, optional multi-stage fusion, no HBM pad/slice
# ---------------------------------------------------------------------------
def time_derivative_dnn_padded(t, x_padded, packed: PackedParams, *,
                               block_b=2048, out_dtype=None):
    """Evaluate the time-derivative MLP on already lane-padded state.

    t:        scalar or (S,) vector of times (RK stages / samples fused per launch).
    x_padded: (B, d_in_pad) or (S, B, d_in_pad) state, kept padded across the solve.
    Returns   (B, d_out_pad) or (S, B, d_out_pad) in x_padded's dtype (or out_dtype).
    """
    assert packed.d_out_pad == packed.d_in_pad

    t_arr = jnp.atleast_1d(jnp.asarray(t, jnp.float32))
    squeeze_stage = (jnp.ndim(x_padded) == 2)
    x3 = x_padded[None] if squeeze_stage else x_padded
    S, B, Dp = x3.shape
    assert Dp == packed.d_in_pad, "state must be lane-padded (use pad_state)"
    if t_arr.shape[0] == 1 and S > 1:
        t_arr = jnp.broadcast_to(t_arr, (S,))
    assert t_arr.shape == (S,)

    out_dtype = x3.dtype if out_dtype is None else out_dtype

    # cdiv-balanced batch tile (multiple of 8 sublanes). Non-divisible trailing
    # tiles are handled by Pallas boundary blocks -> no batch padding in HBM.
    n_tiles = max(1, _ceil_div(B, block_b))
    TB = _round_up(_ceil_div(B, n_tiles), SUBLANE)
    grid_b = _ceil_div(B, TB)

    layers = packed.layers
    n_layers = len(layers)

    flat_args = [t_arr, x3]
    in_specs = [
        pl.BlockSpec(memory_space=pltpu.SMEM),                    # (S,) times
        pl.BlockSpec((1, TB, Dp), lambda s, i: (s, i, 0)),        # state tile
    ]
    for wx_p, aux in layers:
        flat_args.extend([wx_p, aux])
        in_specs.extend([
            pl.BlockSpec(wx_p.shape, lambda s, i: (0, 0)),        # resident weight
            pl.BlockSpec(aux.shape, lambda s, i: (0, 0)),         # resident (wt, b)
        ])

    flops = 2 * S * B * sum(int(w.shape[0]) * int(w.shape[1]) for w, _ in layers)
    transcendentals = S * B * sum(int(w.shape[1]) for w, _ in layers[:-1])
    bytes_accessed = (
        int(x3.size) * x3.dtype.itemsize
        + S * B * packed.d_out_pad * np.dtype(out_dtype).itemsize
        + sum(int(w.size) * w.dtype.itemsize + int(a.size) * a.dtype.itemsize
              for w, a in layers)
        + int(t_arr.size) * 4
    )

    out = pl.pallas_call(
        _make_kernel(n_layers),
        out_shape=jax.ShapeDtypeStruct((S, B, packed.d_out_pad), out_dtype),
        grid=(S, grid_b),
        in_specs=in_specs,
        out_specs=pl.BlockSpec((1, TB, packed.d_out_pad), lambda s, i: (s, i, 0)),
        compiler_params=pltpu.CompilerParams(
            dimension_semantics=("parallel", "parallel")),   # stage x batch tiles
        cost_estimate=pl.CostEstimate(flops=flops,
                                      transcendentals=transcendentals,
                                      bytes_accessed=bytes_accessed),
    )(*flat_args)

    return out[0] if squeeze_stage else out


# ---------------------------------------------------------------------------
# Module-parity wrapper (scalar t, unpadded x) — pads/slices per call.
# For real ODE solves keep the state padded and call the padded hot path.
# ---------------------------------------------------------------------------
def time_derivative_dnn(t, x, packed: PackedParams, *, block_b=2048):
    assert x.shape[-1] == packed.d_in
    x_p = pad_state(x, packed, dtype=x.dtype)
    out_p = time_derivative_dnn_padded(t, x_p, packed, block_b=block_b,
                                       out_dtype=x.dtype)
    out = unpad_state(out_p, packed)
    assert out.shape == x.shape
    return out


# ---------------------------------------------------------------------------
# Pure-JAX reference mimicking the PyTorch module exactly (f32, unpadded)
# ---------------------------------------------------------------------------
def _reference(t, x, params):
    dx = x.astype(jnp.float32)
    B = x.shape[0]
    t_col = jnp.full((B, 1), t, dtype=jnp.float32)
    n = len(params)
    for i, (wx, wt, b) in enumerate(params):
        h_in = jnp.concatenate([dx, t_col], axis=1)
        w_full = jnp.concatenate([wx, wt[None, :]], axis=0)   # (in+1, out)
        dx = h_in @ w_full + b[None, :]
        if i < n - 1:
            dx = jnp.tanh(dx)
    return dx


def _init_linear(key, fan_in, fan_out):
    """Deterministic PyTorch-nn.Linear-style init: U(-1/sqrt(fan_in), 1/sqrt(fan_in))."""
    kw, kb = jax.random.split(key)
    bound = 1.0 / math.sqrt(fan_in)
    w = jax.random.uniform(kw, (fan_in, fan_out), jnp.float32, -bound, bound)
    b = jax.random.uniform(kb, (fan_out,), jnp.float32, -bound, bound)
    wx, wt = w[:-1, :], w[-1, :]     # split off the t column
    return wx, wt, b


if __name__ == "__main__":
    B, D, H = 8, 16, 32   # batch, event dim, hidden dim

    key = jax.random.PRNGKey(0)
    kx, kt, k0, k1, k2, ks, kxs = jax.random.split(key, 7)

    x = jax.random.normal(kx, (B, D), dtype=jnp.float32)
    t = jax.random.uniform(kt, (), dtype=jnp.float32)

    # Layer dims: (D+1 -> H), (H+1 -> H), (H+1 -> D); output shape == input shape.
    params = [
        _init_linear(k0, D + 1, H),
        _init_linear(k1, H + 1, H),
        _init_linear(k2, H + 1, D),
    ]

    # One-time packing: bf16 weights (native MXU dtype), lane-dense padding.
    packed = pack_params(params)

    # 1) Module-parity call: scalar t, unpadded f32 state (exact module interface).
    out = jax.block_until_ready(time_derivative_dnn(t, x, packed))
    ref = _reference(t, x, params)
    assert out.shape == x.shape
    np.testing.assert_allclose(np.asarray(out.astype(jnp.float32)),
                               np.asarray(ref), rtol=2e-2, atol=2e-2)

    # 2) Fused multi-stage hot path: bf16 lane-padded state kept padded across the
    #    solve; S stage/t evaluations in a single launch (weights DMA'd once).
    S = 4
    ts = jax.random.uniform(ks, (S,), dtype=jnp.float32)
    xs = jax.random.normal(kxs, (S, B, D), dtype=jnp.float32)
    xs_padded = pad_state(xs, packed, dtype=jnp.bfloat16)   # pad ONCE per solve
    outs_padded = jax.block_until_ready(
        time_derivative_dnn_padded(ts, xs_padded, packed))
    assert outs_padded.shape == (S, B, packed.d_out_pad)
    assert outs_padded.dtype == jnp.bfloat16
    for s in range(S):
        ref_s = _reference(ts[s], xs[s], params)
        np.testing.assert_allclose(
            np.asarray(unpad_state(outs_padded[s], packed).astype(jnp.float32)),
            np.asarray(ref_s), rtol=3e-2, atol=3e-2)

    print("KERNEL_OK")
</pallas_src>

<mosaic_0001>
module attributes {stable_mosaic.version = 11 : i64} {
  func.func @kernel(%arg0: i32, %arg1: i32, %arg2: memref<1xf32, #tpu.memory_space<smem>>, %arg3: memref<1x8x128xf32, #tpu.memory_space<vmem>>, %arg4: memref<128x128xbf16, #tpu.memory_space<vmem>>, %arg5: memref<2x128xf32, #tpu.memory_space<vmem>>, %arg6: memref<128x128xbf16, #tpu.memory_space<vmem>>, %arg7: memref<2x128xf32, #tpu.memory_space<vmem>>, %arg8: memref<128x128xbf16, #tpu.memory_space<vmem>>, %arg9: memref<2x128xf32, #tpu.memory_space<vmem>>, %arg10: memref<1x8x128xf32, #tpu.memory_space<vmem>>) attributes {dimension_semantics = [#tpu.dimension_semantics<parallel>, #tpu.dimension_semantics<parallel>], iteration_bounds = array<i64: 1, 1>, scalar_prefetch = 0 : i64, scratch_operands = 0 : i64, tpu.core_type = #tpu.core_type<tc>, window_params = [{transform_indices = @transform_0, window_bounds = array<i64: 1>}, {transform_indices = @transform_1, window_bounds = array<i64: 1, 8, 128>}, {pipeline_mode = #tpu.pipeline_mode<synchronous>, transform_indices = @transform_2, window_bounds = array<i64: 128, 128>}, {pipeline_mode = #tpu.pipeline_mode<synchronous>, transform_indices = @transform_3, window_bounds = array<i64: 2, 128>}, {pipeline_mode = #tpu.pipeline_mode<synchronous>, transform_indices = @transform_4, window_bounds = array<i64: 128, 128>}, {pipeline_mode = #tpu.pipeline_mode<synchronous>, transform_indices = @transform_5, window_bounds = array<i64: 2, 128>}, {pipeline_mode = #tpu.pipeline_mode<synchronous>, transform_indices = @transform_6, window_bounds = array<i64: 128, 128>}, {pipeline_mode = #tpu.pipeline_mode<synchronous>, transform_indices = @transform_7, window_bounds = array<i64: 2, 128>}, {transform_indices = @transform_8, window_bounds = array<i64: 1, 8, 128>}]} {
    %0 = arith.index_cast %arg0 : i32 to index
    %1 = memref.load %arg2[%0] : memref<1xf32, #tpu.memory_space<smem>>
    %c0 = arith.constant 0 : index
    %c0_0 = arith.constant 0 : index
    %c0_1 = arith.constant 0 : index
    %2 = vector.load %arg3[%c0, %c0_0, %c0_1] : memref<1x8x128xf32, #tpu.memory_space<vmem>>, vector<1x8x128xf32>
    %3 = vector.shape_cast %2 : vector<1x8x128xf32> to vector<8x128xf32>
    %4 = arith.truncf %3 : vector<8x128xf32> to vector<8x128xbf16>
    %c0_2 = arith.constant 0 : index
    %c0_3 = arith.constant 0 : index
    %5 = vector.load %arg4[%c0_2, %c0_3] : memref<128x128xbf16, #tpu.memory_space<vmem>>, vector<128x128xbf16>
    %cst = arith.constant dense<0.000000e+00> : vector<8x128xf32>
    %6 = tpu.matmul %4, %5, %cst {dimension_numbers = #tpu.dot_dimension_numbers<[1], [0], [0], [1], [0, 0, 1, 1], [], []>} : vector<8x128xbf16>, vector<128x128xbf16>, vector<8x128xf32> -> vector<8x128xf32>
    %c0_4 = arith.constant 0 : index
    %c0_5 = arith.constant 0 : index
    %7 = vector.load %arg5[%c0_4, %c0_5] : memref<2x128xf32, #tpu.memory_space<vmem>>, vector<1x128xf32>
    %8 = vector.broadcast %1 : f32 to vector<1x128xf32>
    %9 = arith.mulf %8, %7 : vector<1x128xf32>
    %c1 = arith.constant 1 : index
    %c0_6 = arith.constant 0 : index
    %10 = vector.load %arg5[%c1, %c0_6] : memref<2x128xf32, #tpu.memory_space<vmem>>, vector<1x128xf32>
    %11 = arith.addf %9, %10 : vector<1x128xf32>
    %12 = vector.broadcast %11 : vector<1x128xf32> to vector<8x128xf32>
    %13 = arith.addf %6, %12 : vector<8x128xf32>
    %14 = math.tanh %13 : vector<8x128xf32>
    %15 = arith.truncf %14 : vector<8x128xf32> to vector<8x128xbf16>
    %c0_7 = arith.constant 0 : index
    %c0_8 = arith.constant 0 : index
    %16 = vector.load %arg6[%c0_7, %c0_8] : memref<128x128xbf16, #tpu.memory_space<vmem>>, vector<128x128xbf16>
    %cst_9 = arith.constant dense<0.000000e+00> : vector<8x128xf32>
    %17 = tpu.matmul %15, %16, %cst_9 {dimension_numbers = #tpu.dot_dimension_numbers<[1], [0], [0], [1], [0, 0, 1, 1], [], []>} : vector<8x128xbf16>, vector<128x128xbf16>, vector<8x128xf32> -> vector<8x128xf32>
    %c0_10 = arith.constant 0 : index
    %c0_11 = arith.constant 0 : index
    %18 = vector.load %arg7[%c0_10, %c0_11] : memref<2x128xf32, #tpu.memory_space<vmem>>, vector<1x128xf32>
    %19 = vector.broadcast %1 : f32 to vector<1x128xf32>
    %20 = arith.mulf %19, %18 : vector<1x128xf32>
    %c1_12 = arith.constant 1 : index
    %c0_13 = arith.constant 0 : index
    %21 = vector.load %arg7[%c1_12, %c0_13] : memref<2x128xf32, #tpu.memory_space<vmem>>, vector<1x128xf32>
    %22 = arith.addf %20, %21 : vector<1x128xf32>
    %23 = vector.broadcast %22 : vector<1x128xf32> to vector<8x128xf32>
    %24 = arith.addf %17, %23 : vector<8x128xf32>
    %25 = math.tanh %24 : vector<8x128xf32>
    %26 = arith.truncf %25 : vector<8x128xf32> to vector<8x128xbf16>
    %c0_14 = arith.constant 0 : index
    %c0_15 = arith.constant 0 : index
    %27 = vector.load %arg8[%c0_14, %c0_15] : memref<128x128xbf16, #tpu.memory_space<vmem>>, vector<128x128xbf16>
    %cst_16 = arith.constant dense<0.000000e+00> : vector<8x128xf32>
    %28 = tpu.matmul %26, %27, %cst_16 {dimension_numbers = #tpu.dot_dimension_numbers<[1], [0], [0], [1], [0, 0, 1, 1], [], []>} : vector<8x128xbf16>, vector<128x128xbf16>, vector<8x128xf32> -> vector<8x128xf32>
    %c0_17 = arith.constant 0 : index
    %c0_18 = arith.constant 0 : index
    %29 = vector.load %arg9[%c0_17, %c0_18] : memref<2x128xf32, #tpu.memory_space<vmem>>, vector<1x128xf32>
    %30 = vector.broadcast %1 : f32 to vector<1x128xf32>
    %31 = arith.mulf %30, %29 : vector<1x128xf32>
    %c1_19 = arith.constant 1 : index
    %c0_20 = arith.constant 0 : index
    %32 = vector.load %arg9[%c1_19, %c0_20] : memref<2x128xf32, #tpu.memory_space<vmem>>, vector<1x128xf32>
    %33 = arith.addf %31, %32 : vector<1x128xf32>
    %34 = vector.broadcast %33 : vector<1x128xf32> to vector<8x128xf32>
    %35 = arith.addf %28, %34 : vector<8x128xf32>
    %c0_21 = arith.constant 0 : index
    %c0_22 = arith.constant 0 : index
    %c0_23 = arith.constant 0 : index
    %36 = vector.load %arg10[%c0_21, %c0_22, %c0_23] : memref<1x8x128xf32, #tpu.memory_space<vmem>>, vector<1x8x128xf32>
    %37 = vector.shape_cast %36 : vector<1x8x128xf32> to vector<8x128xf32>
    %38 = vector.shape_cast %35 : vector<8x128xf32> to vector<1x8x128xf32>
    tpu.vector_store %arg10[%c0_21, %c0_22, %c0_23], %38 {strides = array<i32>} : memref<1x8x128xf32, #tpu.memory_space<vmem>>, vector<1x8x128xf32>,
    return
  }
  func.func @transform_0(%arg0: i32, %arg1: i32) -> i32 {
    %c0_i32 = arith.constant 0 : i32
    %c0_i32_0 = arith.constant 0 : i32
    return %c0_i32 : i32
  }
  func.func @transform_1(%arg0: i32, %arg1: i32) -> (i32, i32, i32) {
    %c0_i32 = arith.constant 0 : i32
    %c0_i32_0 = arith.constant 0 : i32
    return %arg0, %arg1, %c0_i32 : i32, i32, i32
  }
  func.func @transform_2(%arg0: i32, %arg1: i32) -> (i32, i32) {
    %c0_i32 = arith.constant 0 : i32
    %c0_i32_0 = arith.constant 0 : i32
    %c0_i32_1 = arith.constant 0 : i32
    return %c0_i32, %c0_i32_0 : i32, i32
  }
  func.func @transform_3(%arg0: i32, %arg1: i32) -> (i32, i32) {
    %c0_i32 = arith.constant 0 : i32
    %c0_i32_0 = arith.constant 0 : i32
    %c0_i32_1 = arith.constant 0 : i32
    return %c0_i32, %c0_i32_0 : i32, i32
  }
  func.func @transform_4(%arg0: i32, %arg1: i32) -> (i32, i32) {
    %c0_i32 = arith.constant 0 : i32
    %c0_i32_0 = arith.constant 0 : i32
    %c0_i32_1 = arith.constant 0 : i32
    return %c0_i32, %c0_i32_0 : i32, i32
  }
  func.func @transform_5(%arg0: i32, %arg1: i32) -> (i32, i32) {
    %c0_i32 = arith.constant 0 : i32
    %c0_i32_0 = arith.constant 0 : i32
    %c0_i32_1 = arith.constant 0 : i32
    return %c0_i32, %c0_i32_0 : i32, i32
  }
  func.func @transform_6(%arg0: i32, %arg1: i32) -> (i32, i32) {
    %c0_i32 = arith.constant 0 : i32
    %c0_i32_0 = arith.constant 0 : i32
    %c0_i32_1 = arith.constant 0 : i32
    return %c0_i32, %c0_i32_0 : i32, i32
  }
  func.func @transform_7(%arg0: i32, %arg1: i32) -> (i32, i32) {
    %c0_i32 = arith.constant 0 : i32
    %c0_i32_0 = arith.constant 0 : i32
    %c0_i32_1 = arith.constant 0 : i32
    return %c0_i32, %c0_i32_0 : i32, i32
  }
  func.func @transform_8(%arg0: i32, %arg1: i32) -> (i32, i32, i32) {
    %c0_i32 = arith.constant 0 : i32
    %c0_i32_0 = arith.constant 0 : i32
    return %arg0, %arg1, %c0_i32 : i32, i32, i32
  }
}

</mosaic_0001>

<bundles_post_ra>
// kernel: tpu_custom_call.1
= control target key start
LH: loop header
LB: loop body
LE: loop exit
PB: predicated region body
PF: predicated region fallthrough
CT: control target
= control target key end

     0   :  { %14 = vsyncpa [#allocation4], 0  ;;  %s887_s0 = inlined_call_operand.<no memory space> [shape: f32[1], index: 0, kind: input, shape index: {}]   ;;  %s888_s1 = inlined_call_operand.hbm [shape: f32[1,8,128], index: 1, kind: input, shape index: {}]   ;;  %s889_s2 = inlined_call_operand.hbm [shape: bf16[128,128], index: 2, kind: input, shape index: {}]   ;;  %s890_s3 = inlined_call_operand.vmem [shape: f32[2,128], index: 3, kind: input, shape index: {}]   ;;  %s891_s4 = inlined_call_operand.hbm [shape: bf16[128,128], index: 4, kind: input, shape index: {}]   ;;  %s892_s5 = inlined_call_operand.vmem [shape: f32[2,128], index: 5, kind: input, shape index: {}]   ;;  %s893_s6 = inlined_call_operand.hbm [shape: bf16[128,128], index: 6, kind: input, shape index: {}]   ;;  %s894_s7 = inlined_call_operand.vmem [shape: f32[2,128], index: 7, kind: input, shape index: {}]   ;;  %s895_s8 = inlined_call_operand.hbm [shape: f32[1,8,128], index: 8, kind: output, shape index: {}]  }
   0x1   :  { %15 = vsyncpa [#allocation7], 0 }
   0x2   :  { %16 = vsyncpa [#allocation10], 0 }
   0x3   :  { %17 = vsyncpa [#allocation5], 0  ;;  %s713_s27 = smov [#allocation6]   ;;  %s595_s9 = scalar_lea.hbm %s889_s2, 1024 }
   0x4   :  { %s35_s28 = sshll.u32 %s713_s27, 4  ;;  %p596_p0 = scmp.ne.s32.totalorder %s889_s2, %s595_s9  ;;  %s36_s28 = int_to_ptr.vmem [resolvable:$true] %s35_s28 }
   0x5   :  { %p599_p1 = scmp.lt.u32.totalorder %s595_s9, %s889_s2 }
   0x7   :  { %p601_p2 = pnand %p599_p1, %p596_p0 }
   0x9   :  { %604 = shalt.err (!%p601_p2)
}
   0xa   :  { %s605_s14 = scalar_lea.vmem %s36_s28, 1024  ;;  %p610_p4 = scmp.lt.s32.totalorder %s36_s28, %s36_s28 }
   0xb   :  { %p606_p3 = scmp.ne.s32.totalorder %s36_s28, %s605_s14  ;;  %p611_p5 = scmp.lt.s32.totalorder %s605_s14, %s605_s14 }
   0xd   :  { %p612_p6 = por %p611_p5, %p610_p4 }
   0xf   :  { %p613_p7 = pnand %p612_p6, %p606_p3 }
  0x11   :  { %616 = shalt.err (!%p613_p7)
}
  0x12   :  { %s714_s15 = smov 64   ;;  %s715_s16 = smov 4  }
  0x13   :  { %41 = dma.hbm_to_vmem [thread:$0]  %s889_s2, 1024, %s36_s28, [#allocation7], %s714_s15, %s714_s15, %s715_s16  }
  0x14   :  { %s716_s19 = smov [#allocation3]   ;;  %s717_s21 = smov [#allocation8]  }
  0x15   :  { %s26_s20 = sshll.u32 %s716_s19, 4  ;;  %s49_s22 = sshll.u32 %s717_s21, 4  ;;  %s27_s20 = int_to_ptr.vmem [resolvable:$true] %s26_s20  ;;  %s50_s22 = int_to_ptr.vmem [resolvable:$true] %s49_s22 }
  0x16   :  { %s617_s25 = scalar_lea.hbm %s888_s1, 128 }
  0x17   :  { %p618_p8 = scmp.ne.s32.totalorder %s888_s1, %s617_s25  ;;  %p621_p9 = scmp.lt.u32.totalorder %s617_s25, %s888_s1 }
  0x19   :  { %p623_p10 = pnand %p621_p9, %p618_p8 }
  0x1b   :  { %626 = shalt.err (!%p623_p10)
}
  0x1c   :  { %s627_s2 = scalar_lea.vmem %s27_s20, 128  ;;  %p632_p12 = scmp.lt.s32.totalorder %s27_s20, %s27_s20 }
  0x1d   :  { %p628_p11 = scmp.ne.s32.totalorder %s27_s20, %s627_s2  ;;  %p633_p13 = scmp.lt.s32.totalorder %s627_s2, %s627_s2 }
  0x1f   :  { %p634_p0 = por %p633_p13, %p632_p12 }
  0x21   :  { %p635_p1 = pnand %p634_p0, %p628_p11 }
  0x23   :  { %638 = shalt.err (!%p635_p1)
}
  0x24   :  { %29 = dma.hbm_to_vmem [thread:$0]  %s888_s1, 128, %s27_s20, [#allocation4]  }
  0x25   :  { %s639_s12 = scalar_lea.hbm %s891_s4, 1024 }
  0x26   :  { %p640_p2 = scmp.ne.s32.totalorder %s891_s4, %s639_s12  ;;  %p643_p3 = scmp.lt.u32.totalorder %s639_s12, %s891_s4 }
  0x28   :  { %p645_p4 = pnand %p643_p3, %p640_p2 }
  0x2a   :  { %648 = shalt.err (!%p645_p4)
}
  0x2b   :  { %s649_s19 = scalar_lea.vmem %s50_s22, 1024  ;;  %p654_p6 = scmp.lt.s32.totalorder %s50_s22, %s50_s22 }
  0x2c   :  { %p650_p5 = scmp.ne.s32.totalorder %s50_s22, %s649_s19  ;;  %p655_p7 = scmp.lt.s32.totalorder %s649_s19, %s649_s19 }
  0x2e   :  { %p656_p8 = por %p655_p7, %p654_p6 }
  0x30   :  { %p657_p9 = pnand %p656_p8, %p650_p5 }
  0x32   :  { %660 = shalt.err (!%p657_p9)
}
  0x33   :  { %55 = dma.hbm_to_vmem [thread:$0]  %s891_s4, 1024, %s50_s22, [#allocation7], %s714_s15, %s714_s15, %s715_s16  }
  0x34   :  { %s718_s21 = smov [#allocation9]   ;;  %s661_s26 = scalar_lea.hbm %s893_s6, 1024 }
  0x35   :  { %s63_s23 = sshll.u32 %s718_s21, 4  ;;  %p662_p10 = scmp.ne.s32.totalorder %s893_s6, %s661_s26  ;;  %s64_s23 = int_to_ptr.vmem [resolvable:$true] %s63_s23 }
  0x36   :  { %p665_p11 = scmp.lt.u32.totalorder %s661_s26, %s893_s6 }
  0x38   :  { %p667_p12 = pnand %p665_p11, %p662_p10 }
  0x3a   :  { %670 = shalt.err (!%p667_p12)
}
  0x3b   :  { %s671_s28 = scalar_lea.vmem %s64_s23, 1024  ;;  %p676_p0 = scmp.lt.s32.totalorder %s64_s23, %s64_s23 }
  0x3c   :  { %p672_p13 = scmp.ne.s32.totalorder %s64_s23, %s671_s28  ;;  %p677_p1 = scmp.lt.s32.totalorder %s671_s28, %s671_s28 }
  0x3e   :  { %p678_p2 = por %p677_p1, %p676_p0 }
  0x40   :  { %p679_p3 = pnand %p678_p2, %p672_p13 }
  0x42   :  { %682 = shalt.err (!%p679_p3)
}
  0x43   :  { %69 = dma.hbm_to_vmem [thread:$0]  %s893_s6, 1024, %s64_s23, [#allocation10], %s714_s15, %s714_s15, %s715_s16  }
  0x44   :  { %705 = dma.done.wait [#allocation4], 128  }
  0x45   :  { %706 = vsyncadd [#allocation4], 4294967168 }
  0x46   :  { %707 = dma.done.wait [#allocation7], 2048  }
  0x47   :  { %708 = vsyncadd [#allocation7], 4294965248 }
  0x48   :  { %709 = dma.done.wait [#allocation10], 1024  }
  0x49   :  { %710 = vsyncadd [#allocation10], 4294966272  ;;  %v719_v0 = vmov 0.0   ;;  %vm720_vm0 = vmmov 0   ;;  %v567_v1 = vld [vmem:[#allocation6] sm:$0xff]   ;;  %v568_v2 = vld [vmem:[#allocation6 + $0x8] sm:$0xff]   ;;  %v109_v23 = vlaneseq  ;;  %v105_v25 = vstv %s887_s0 }
  0x4a   :  { %498 = vmatprep.subr.bf16.mxu0 %v719_v0  ;;  %514 = vmatprep.mubr.msk.bf16.mxu0 %vm720_vm0, %v719_v0  ;;  %v569_v3 = vld [vmem:[#allocation6 + $0x10] sm:$0xff]   ;;  %v575_v4 = vld [vmem:[#allocation8] sm:$0xff]   ;;  %v570_v5 = vld [vmem:[#allocation6 + $0x18] sm:$0xff]  }
  0x4b   :  { %518 = vmatprep.subr.bf16.mxu1 %v719_v0  ;;  %534 = vmatprep.mubr.msk.bf16.mxu1 %vm720_vm0, %v719_v0  ;;  %v576_v6 = vld [vmem:[#allocation8 + $0x8] sm:$0xff]   ;;  %v571_v7 = vld [vmem:[#allocation6 + $0x20] sm:$0xff]   ;;  %v577_v8 = vld [vmem:[#allocation8 + $0x10] sm:$0xff]   ;;  %v110_v27 = vshrl.u32 %v109_v23, 7 }
  0x4c   :  { %499 = vmatpush3.bf16.msra.mxu0 %v567_v1  ;;  %519 = vmatpush3.bf16.msra.mxu1 %v575_v4  ;;  %v572_v9 = vld [vmem:[#allocation6 + $0x28] sm:$0xff]   ;;  %v578_v10 = vld [vmem:[#allocation8 + $0x18] sm:$0xff]   ;;  %v573_v11 = vld [vmem:[#allocation6 + $0x30] sm:$0xff]  }
  0x4d   :  { %500 = vmatprep.subr.bf16.mxu0 %v719_v0  ;;  %520 = vmatprep.subr.bf16.mxu1 %v719_v0  ;;  %v574_v12 = vld [vmem:[#allocation6 + $0x38] sm:$0xff]   ;;  %v579_v15 = vld [vmem:[#allocation8 + $0x20] sm:$0xff]   ;;  %v580_v16 = vld [vmem:[#allocation8 + $0x28] sm:$0xff]   ;;  %v111_v30 = vsub.s32 0, %v110_v27 }
  0x4e   :  { %v86_v13 = vld [vmem:[#allocation3] sm:$0xff]  ;;  %v581_v17 = vld [vmem:[#allocation8 + $0x30] sm:$0xff]   ;;  %v583_v19 = vld [vmem:[#allocation9] sm:$0xff]  }
  0x4f   :  { %v87_v14 = vpack.c.bf16 %v86_v13, %v86_v13  ;;  %v582_v18 = vld [vmem:[#allocation8 + $0x38] sm:$0xff]   ;;  %v584_v20 = vld [vmem:[#allocation9 + $0x8] sm:$0xff]   ;;  %v585_v21 = vld [vmem:[#allocation9 + $0x10] sm:$0xff]  }
  0x50   :  { %501 = vmatpush3.bf16.msra.mxu0 %v568_v2  ;;  %521 = vmatpush3.bf16.msra.mxu1 %v576_v6  ;;  %v586_v22 = vld [vmem:[#allocation9 + $0x18] sm:$0xff]   ;;  %v587_v39 = vld [vmem:[#allocation9 + $0x20] sm:$0xff]   ;;  %v588_v40 = vld [vmem:[#allocation9 + $0x28] sm:$0xff]  }
  0x51   :  { %502 = vmatprep.subr.bf16.mxu0 %v719_v0  ;;  %522 = vmatprep.subr.bf16.mxu1 %v719_v0  ;;  %v104_v24 = vld [vmem:[%s890_s3] sm:$0x1]  ;;  %v107_v28 = vld [vmem:[%s890_s3 + $0x1] sm:$0x1]  ;;  %v589_v41 = vld [vmem:[#allocation9 + $0x30] sm:$0xff]  }
  0x52   :  { %v106_v26 = vmul.f32 %v105_v25, %v104_v24  ;;  %v590_v42 = vld [vmem:[#allocation9 + $0x38] sm:$0xff]  }
  0x53   :  { %v219_v43 = vld [vmem:[%s892_s5] sm:$0x1]  ;;  %v221_v45 = vld [vmem:[%s892_s5 + $0x1] sm:$0x1]  ;;  %s721_s5 = smov [#allocation11]  }
  0x54   :  { %503 = vmatpush3.bf16.msra.mxu0 %v569_v3  ;;  %523 = vmatpush3.bf16.msra.mxu1 %v577_v8  ;;  %v108_v29 = vadd.f32 %v107_v28, %v106_v26  ;;  %v220_v44 = vmul.f32 %v219_v43, %v105_v25  ;;  %v333_v55 = vld [vmem:[%s894_s7] sm:$0x1]  ;;  %v335_v57 = vld [vmem:[%s894_s7 + $0x1] sm:$0x1]  ;;  %s436_s1 = sshll.u32 %s721_s5, 4  ;;  %s437_s1 = int_to_ptr.vmem [resolvable:$true] %s436_s1 }
  0x55   :  { %504 = vmatprep.subr.bf16.mxu0 %v719_v0  ;;  %524 = vmatprep.subr.bf16.mxu1 %v719_v0  ;;  %v334_v56 = vmul.f32 %v333_v55, %v105_v25  ;;  %s683_s20 = scalar_lea.vmem %s437_s1, 128  ;;  %p688_p5 = scmp.lt.s32.totalorder %s437_s1, %s437_s1 }
  0x56   :  { %v112_v31 = vrot.slane %v108_v29, %v111_v30  ;;  %v222_v46 = vadd.f32 %v221_v45, %v220_v44  ;;  %p684_p4 = scmp.ne.s32.totalorder %s437_s1, %s683_s20  ;;  %p689_p6 = scmp.lt.s32.totalorder %s683_s20, %s683_s20 }
  0x57   :  { %v336_v58 = vadd.f32 %v335_v57, %v334_v56 }
  0x58   :  { %505 = vmatpush3.bf16.msra.mxu0 %v570_v5  ;;  %525 = vmatpush3.bf16.msra.mxu1 %v578_v10  ;;  %v226_v47 = vrot.slane %v222_v46, %v111_v30  ;;  %p690_p7 = por %p689_p6, %p688_p5 }
  0x59   :  { %506 = vmatprep.subr.bf16.mxu0 %v719_v0  ;;  %526 = vmatprep.subr.bf16.mxu1 %v719_v0  ;;  %v340_v59 = vrot.slane %v336_v58, %v111_v30 }
  0x5a   :  { %p691_p8 = pnand %p690_p7, %p684_p4 }
  0x5c   :  { %507 = vmatpush3.bf16.msra.mxu0 %v571_v7  ;;  %527 = vmatpush3.bf16.msra.mxu1 %v579_v15 }
  0x5d   :  { %508 = vmatprep.subr.bf16.mxu0 %v719_v0  ;;  %528 = vmatprep.subr.bf16.mxu1 %v719_v0 }
  0x60   :  { %509 = vmatpush3.bf16.msra.mxu0 %v572_v9  ;;  %529 = vmatpush3.bf16.msra.mxu1 %v580_v16 }
  0x61   :  { %510 = vmatprep.subr.bf16.mxu0 %v719_v0  ;;  %530 = vmatprep.subr.bf16.mxu1 %v719_v0 }
  0x64   :  { %511 = vmatpush3.bf16.msra.mxu0 %v573_v11  ;;  %531 = vmatpush3.bf16.msra.mxu1 %v581_v17 }
  0x65   :  { %512 = vmatprep.subr.bf16.mxu0 %v719_v0  ;;  %532 = vmatprep.subr.bf16.mxu1 %v719_v0 }
  0x68   :  { %513 = vmatpush3.bf16.msra.mxu0 %v574_v12  ;;  %533 = vmatpush3.bf16.msra.mxu1 %v582_v18 }
  0x69   :  { %538 = vmatprep.subr.bf16.mxu0 %v719_v0 }
  0x6b   :  { %515 = vmatmul.mubr.bf16.vlgmr.msra.gmra.mrb[0].mxu0 %v87_v14 }
  0x6c   :  { %554 = vmatprep.mubr.msk.bf16.mxu0 %vm720_vm0, %v719_v0  ;;  %539 = vmatpush3.bf16.msra.mxu0 %v583_v19 }
  0x6d   :  { %540 = vmatprep.subr.bf16.mxu0 %v719_v0 }
  0x70   :  { %541 = vmatpush3.bf16.msra.mxu0 %v584_v20 }
  0x71   :  { %542 = vmatprep.subr.bf16.mxu0 %v719_v0 }
  0x74   :  { %543 = vmatpush3.bf16.msra.mxu0 %v585_v21 }
  0x75   :  { %544 = vmatprep.subr.bf16.mxu0 %v719_v0 }
  0x78   :  { %545 = vmatpush3.bf16.msra.mxu0 %v586_v22 }
  0x79   :  { %546 = vmatprep.subr.bf16.mxu0 %v719_v0 }
  0x7c   :  { %547 = vmatpush3.bf16.msra.mxu0 %v587_v39 }
  0x7d   :  { %548 = vmatprep.subr.bf16.mxu0 %v719_v0 }
  0x80   :  { %549 = vmatpush3.bf16.msra.mxu0 %v588_v40 }
  0x81   :  { %550 = vmatprep.subr.bf16.mxu0 %v719_v0 }
  0x84   :  { %551 = vmatpush3.bf16.msra.mxu0 %v589_v41 }
  0x85   :  { %552 = vmatprep.subr.bf16.mxu0 %v719_v0 }
  0x88   :  { %553 = vmatpush3.bf16.msra.mxu0 %v590_v42 }
 0x13e   :  { %v195_v32 = vpop.f32.mrb[0].mxu0 }
 0x13f   :  { %v196_v33 = vadd.f32 %v195_v32, %v112_v31  ;;  %v516_v34 = vpop.f32.mrb[1].mxu0 }
 0x140   :  { %v198_v35 = vpop.f32.mrb[2].mxu0 }
 0x141   :  { %591 = vtanh.f32 %v196_v33  ;;  %v517_v36 = vpop.f32.mrb[3].mxu0 }
 0x14b   :  { %v592_v37 = vpop.eup %591 }
 0x14c   :  { %v202_v38 = vpack.c.bf16 %v592_v37, %v592_v37 }
 0x14e   :  { %535 = vmatmul.mubr.bf16.vlgmr.msra.gmra.mrb[0].mxu1 %v202_v38 }
 0x221   :  { %v309_v48 = vpop.f32.mrb[0].mxu1 }
 0x222   :  { %v310_v49 = vadd.f32 %v309_v48, %v226_v47  ;;  %v536_v50 = vpop.f32.mrb[1].mxu1 }
 0x223   :  { %v312_v51 = vpop.f32.mrb[2].mxu1 }
 0x224   :  { %593 = vtanh.f32 %v310_v49  ;;  %v537_v52 = vpop.f32.mrb[3].mxu1 }
 0x22e   :  { %v594_v53 = vpop.eup %593 }
 0x22f   :  { %v316_v54 = vpack.c.bf16 %v594_v53, %v594_v53 }
 0x231   :  { %555 = vmatmul.mubr.bf16.vlgmr.msra.gmra.mrb[4].mxu0 %v316_v54 }
 0x304   :  { %v423_v60 = vpop.f32.mrb[4].mxu0 }
 0x305   :  { %v424_v61 = vadd.f32 %v423_v60, %v340_v59  ;;  %v556_v62 = vpop.f32.mrb[5].mxu0 }
 0x306   :  { %v426_v63 = vpop.f32.mrb[6].mxu0 }
 0x307   :  { %429 = vst [vmem:[#allocation11] sm:$0xff] %v424_v61  ;;  %v557_v0 = vpop.f32.mrb[7].mxu0 }
 0x308   :  { %694 = shalt.err (!%p691_p8)
}
 0x309   :  { %s695_s23 = scalar_lea.hbm %s895_s8, 128 }
 0x30a   :  { %p696_p9 = scmp.ne.s32.totalorder %s895_s8, %s695_s23  ;;  %p699_p10 = scmp.lt.u32.totalorder %s695_s23, %s895_s8 }
 0x30c   :  { %p701_p11 = pnand %p699_p10, %p696_p9 }
 0x30e   :  { %704 = shalt.err (!%p701_p11)
}
 0x30f   :  { %439 = dma.vmem_to_hbm [thread:$0]  %s437_s1, 128, %s895_s8, [#allocation5]  }
 0x310   :  { %711 = dma.done.wait [#allocation5], 128  }
 0x311   :  { %712 = vsyncadd [#allocation5], 4294967168 }
 0x312   :  { %443 = vsyncpa [#allocation4], 1 }
 0x313   :  { %444 = vsyncpa [#allocation7], 1 }
 0x314   :  { %445 = vsyncpa [#allocation10], 1 }
 0x315   :  { %446 = vsyncpa [#allocation5], 1 }

</bundles_post_ra>
